<compile_context>
chip_gen: v5e
topology: v5e:2x2
jax: 0.10.0
libtpu: 0.0.40
codegen_flags: <defaults>
</compile_context>

<pallas_src>
import jax
import jax.numpy as jnp
import numpy as np
from jax import lax
from jax.experimental import pallas as pl
from jax.experimental.pallas import tpu as pltpu


def _round_up(x, m):
    return ((x + m - 1) // m) * m


def _vmem_cap_bytes():
    try:
        info = pltpu.get_tpu_info()
        return int(getattr(info, "vmem_capacity_bytes", 64 * 1024 * 1024))
    except Exception:
        return 64 * 1024 * 1024


# ----------------------------------------------------------------------------
# Pallas kernel: fused embedding pooling + scale + MLP stack for one batch tile
# ----------------------------------------------------------------------------
def _make_dan_kernel(num_layers, seq_len, vocab_p, high_precision):
    """Refs: ids (TB, L) i32, scale (TB, 1) f32, table (Vp, Ep),
    [W_i (Din_p, Hp), b_i (1, Hp)] * num_layers, out (TB, out_p) f32."""
    prec = lax.Precision.HIGHEST if high_precision else None

    def kernel(*refs):
        ids_ref, scale_ref, table_ref = refs[0], refs[1], refs[2]
        o_ref = refs[-1]
        wb_refs = refs[3:-1]
        tb = ids_ref.shape[0]

        # ---- fused embedding pooling ---------------------------------------
        # counts[b, v] = #occurrences of token v in row b.  The table's
        # padding row (index 0) is all zeros, so pad tokens drop out of the
        # sum automatically (matches nn.Embedding(padding_idx=0)).  The pooled
        # sum is then a single MXU matmul: counts @ table.
        ids = ids_ref[...]                                       # (TB, L) i32
        vocab_iota = lax.broadcasted_iota(jnp.int32, (tb, vocab_p), 1)
        counts = jnp.zeros((tb, vocab_p), jnp.float32)
        # Static per-position loop keeps the live set at one (TB, Vp) slab.
        # TODO(synk): for very long sequences or very large vocabularies use a
        # manual DMA row-gather instead of this count-matrix route.
        for l in range(seq_len):
            counts = counts + (ids[:, l:l + 1] == vocab_iota).astype(jnp.float32)

        # counts <= seq_len, so the cast to the table dtype (bf16) is exact.
        x = jnp.dot(counts.astype(table_ref.dtype), table_ref[...],
                    preferred_element_type=jnp.float32,
                    precision=prec)                              # (TB, Ep) f32
        # Per-row scale: 1/length (averaging) or 1.0 (summing); broadcast on
        # the VPU from its true (TB, 1) shape -- no materialized broadcast.
        x = x * scale_ref[...]

        # ---- MLP stack: [Linear, ReLU] * num_layers --------------------------
        # TODO(synk): nn.Dropout is identity at inference and BatchNorm1d
        # training-mode batch statistics are not implemented (batch_norm=False
        # path); eval-mode forward semantics are preserved.
        for i in range(num_layers):
            w_ref = wb_refs[2 * i]
            b_ref = wb_refs[2 * i + 1]
            x = jnp.dot(x.astype(w_ref.dtype), w_ref[...],
                        preferred_element_type=jnp.float32, precision=prec)
            x = x + b_ref[...].astype(jnp.float32)
            x = jnp.maximum(x, 0.0)                              # ReLU

        o_ref[...] = x.astype(o_ref.dtype)

    return kernel


# ----------------------------------------------------------------------------
# Wrapper: pad params to lane-dense widths, tile batch, call pallas_call
# ----------------------------------------------------------------------------
def dan_features_pallas(data, scale, emb_table, weights, biases, *, tb=256,
                        param_dtype=jnp.bfloat16):
    """data: (B, L) int token ids; scale: (B, 1) f32; emb_table: (V, E);
    weights[i]: (Din_i, H); biases[i]: (1, H).  Returns (B, H) f32
    (or (B, E) when num_layers == 0)."""
    B, L = data.shape
    V, E = emb_table.shape
    num_layers = len(weights)
    out_dim = weights[-1].shape[1] if num_layers else E
    high_precision = jnp.dtype(param_dtype) == jnp.dtype(jnp.float32)

    # --- pad parameters to lane-dense (multiple-of-128) widths and cast ------
    Vp = _round_up(V, 128)
    Ep = _round_up(E, 128)
    Hp = _round_up(out_dim, 128)          # == Ep when num_layers == 0
    out_dim_p = Hp

    table_p = jnp.zeros((Vp, Ep), param_dtype)
    table_p = table_p.at[:V, :E].set(emb_table.astype(param_dtype))

    ws_p, bs_p = [], []
    for i, (w, b) in enumerate(zip(weights, biases)):
        din, dout = w.shape
        din_p = Ep if i == 0 else Hp
        wp = jnp.zeros((din_p, Hp), param_dtype)
        wp = wp.at[:din, :dout].set(w.astype(param_dtype))
        bp = jnp.zeros((1, Hp), param_dtype)
        bp = bp.at[:, :dout].set(b.astype(param_dtype))
        ws_p.append(wp)
        bs_p.append(bp)

    # --- batch tiling ---------------------------------------------------------
    # Large batch tiles amortize the ~0.35us per-grid-step cost and feed the
    # MXU tall matmuls.  Clamp for tiny batches; split so the "parallel" grid
    # has >= 2 steps when possible (populates both v7x TensorCores).
    tb = max(8, (int(tb) // 8) * 8)
    tb_eff = min(tb, _round_up(B, 8))
    if _round_up(B, 8) >= 16 and pl.cdiv(B, tb_eff) < 2:
        tb_eff = _round_up(pl.cdiv(_round_up(B, 8), 2), 8)
    grid_b = pl.cdiv(B, tb_eff)
    Bp = grid_b * tb_eff

    data_p = data.astype(jnp.int32)
    scale_p = scale.astype(jnp.float32)
    if Bp != B:
        # Padded rows get id 0 (zero embedding row) and scale 1.0; sliced away.
        data_p = jnp.pad(data_p, ((0, Bp - B), (0, 0)))
        scale_p = jnp.pad(scale_p, ((0, Bp - B), (0, 0)), constant_values=1.0)

    in_specs = [
        pl.BlockSpec((tb_eff, L), lambda b: (b, 0)),       # id tile
        pl.BlockSpec((tb_eff, 1), lambda b: (b, 0)),       # per-row scale
        # Constant index_maps: table / weights / biases stay VMEM-resident
        # across the whole grid instead of being re-streamed per step.
        pl.BlockSpec((Vp, Ep), lambda b: (0, 0)),
    ]
    operands = [data_p, scale_p, table_p]
    for wp, bp in zip(ws_p, bs_p):
        in_specs.append(pl.BlockSpec(wp.shape, lambda b: (0, 0)))
        in_specs.append(pl.BlockSpec(bp.shape, lambda b: (0, 0)))
        operands.append(wp)
        operands.append(bp)

    # --- explicit VMEM budget, capped to the current generation --------------
    itemsize = jnp.dtype(param_dtype).itemsize
    est = 2 * tb_eff * L * 4                               # ids (double-buffered)
    est += 2 * tb_eff * 4                                  # scale
    est += 2 * Vp * Ep * itemsize                          # table (worst case)
    est += sum(2 * (wp.size + bp.size) * itemsize for wp, bp in zip(ws_p, bs_p))
    est += 2 * tb_eff * out_dim_p * 4                      # output tile
    est += tb_eff * Vp * 4                                 # counts accumulator
    est += 4 * tb_eff * max(Ep, out_dim_p) * 4             # activations/headroom
    vmem_limit = max(32 * 1024 * 1024, est + (8 << 20))
    vmem_limit = int(min(vmem_limit, (_vmem_cap_bytes() * 3) // 4))

    out = pl.pallas_call(
        _make_dan_kernel(num_layers, L, Vp, high_precision),
        out_shape=jax.ShapeDtypeStruct((Bp, out_dim_p), jnp.float32),
        grid=(grid_b,),
        in_specs=in_specs,
        out_specs=pl.BlockSpec((tb_eff, out_dim_p), lambda b: (b, 0)),
        compiler_params=pltpu.CompilerParams(
            dimension_semantics=("parallel",),   # shards batch across TCs (v7x)
            vmem_limit_bytes=vmem_limit),
    )(*operands)
    return out[:B, :out_dim]


# ----------------------------------------------------------------------------
# Parameter init + forward
# ----------------------------------------------------------------------------
def init_dan_params(key, vocab_size, emb_size, num_layers, hidden_size):
    keys = jax.random.split(key, 1 + 2 * max(num_layers, 1))
    emb = jax.random.normal(keys[0], (vocab_size, emb_size), jnp.float32) * 0.1
    emb = emb.at[0].set(0.0)  # padding_idx = 0 -> zero embedding row
    weights, biases = [], []
    d_in = emb_size
    for i in range(num_layers):
        kw, kb = keys[1 + 2 * i], keys[2 + 2 * i]
        bound = 1.0 / float(np.sqrt(d_in))
        weights.append(jax.random.uniform(
            kw, (d_in, hidden_size), jnp.float32, minval=-bound, maxval=bound))
        biases.append(jax.random.uniform(
            kb, (1, hidden_size), jnp.float32, minval=-bound, maxval=bound))
        d_in = hidden_size
    return {'embedding': emb, 'weights': weights, 'biases': biases}


def dan_forward(params, data, lengths, *, sum_pooling=False,
                param_dtype=jnp.bfloat16, tb=256):
    """Forward matching DANFeatureExtractor.forward((data, lengths))."""
    if sum_pooling:
        scale = jnp.ones((data.shape[0], 1), jnp.float32)
    else:
        # Precompute the reciprocal once in the wrapper; multiply in-kernel.
        # (~1 ulp from the reference divide; zero-length rows yield inf just
        # like the reference divide would.)
        scale = (1.0 / lengths.astype(jnp.float32))[:, None]
    return dan_features_pallas(data, scale, params['embedding'],
                               params['weights'], params['biases'],
                               tb=tb, param_dtype=param_dtype)


# ----------------------------------------------------------------------------
# Pure-JAX reference for correctness checking
# ----------------------------------------------------------------------------
def _reference_forward(params, data, lengths, *, sum_pooling=False):
    embeds = params['embedding'][data]                 # (B, L, E)
    x = embeds.sum(axis=1)
    if not sum_pooling:
        x = x / lengths.astype(jnp.float32)[:, None]
    for w, b in zip(params['weights'], params['biases']):
        x = jnp.maximum(
            jnp.dot(x, w, precision=lax.Precision.HIGHEST) + b, 0.0)
    return x


def _cast_params(params, dtype):
    cast = lambda a: a.astype(dtype).astype(jnp.float32)
    return {'embedding': cast(params['embedding']),
            'weights': [cast(w) for w in params['weights']],
            'biases': [cast(b) for b in params['biases']]}


# ----------------------------------------------------------------------------
if __name__ == "__main__":
    key = jax.random.PRNGKey(0)
    vocab_size, emb_size, hidden_size = 50, 32, 32
    num_layers = 2
    batch, max_len = 4, 8

    k_params, k_data, k_len = jax.random.split(key, 3)
    params = init_dan_params(k_params, vocab_size, emb_size,
                             num_layers, hidden_size)

    lengths = jax.random.randint(k_len, (batch,), 3, max_len + 1)
    data = jax.random.randint(k_data, (batch, max_len), 1, vocab_size)
    # Zero-out (pad) positions beyond each row's length (padding_idx = 0),
    # mirroring padded minibatches fed to the torch module.
    pos = jnp.arange(max_len)[None, :]
    data = jnp.where(pos < lengths[:, None], data, 0)

    for sum_pooling in (False, True):   # AveragingLayer and SummingLayer paths
        # Exact-semantics check: f32 parameters, tight tolerance.
        out_f32 = jax.block_until_ready(
            dan_forward(params, data, lengths, sum_pooling=sum_pooling,
                        param_dtype=jnp.float32))
        ref = _reference_forward(params, data, lengths,
                                 sum_pooling=sum_pooling)
        np.testing.assert_allclose(np.asarray(out_f32), np.asarray(ref),
                                   rtol=1e-5, atol=1e-5)

        # Default fast path: bf16 table/weights, f32 MXU accumulation.
        out_bf16 = jax.block_until_ready(
            dan_forward(params, data, lengths, sum_pooling=sum_pooling,
                        param_dtype=jnp.bfloat16))
        ref_bf16 = _reference_forward(_cast_params(params, jnp.bfloat16),
                                      data, lengths, sum_pooling=sum_pooling)
        np.testing.assert_allclose(np.asarray(out_bf16), np.asarray(ref_bf16),
                                   rtol=2e-2, atol=2e-2)

    print("KERNEL_OK")
</pallas_src>

<mosaic_0001>
module attributes {stable_mosaic.version = 11 : i64} {
  func.func @kernel(%arg0: i32, %arg1: memref<8x8xi32, #tpu.memory_space<vmem>>, %arg2: memref<8x1xf32, #tpu.memory_space<vmem>>, %arg3: memref<128x128xf32, #tpu.memory_space<vmem>>, %arg4: memref<128x128xf32, #tpu.memory_space<vmem>>, %arg5: memref<1x128xf32, #tpu.memory_space<vmem>>, %arg6: memref<128x128xf32, #tpu.memory_space<vmem>>, %arg7: memref<1x128xf32, #tpu.memory_space<vmem>>, %arg8: memref<8x128xf32, #tpu.memory_space<vmem>>) attributes {dimension_semantics = [#tpu.dimension_semantics<parallel>], iteration_bounds = array<i64: 1>, scalar_prefetch = 0 : i64, scratch_operands = 0 : i64, tpu.core_type = #tpu.core_type<tc>, window_params = [{transform_indices = @transform_0, window_bounds = array<i64: 8, 8>}, {transform_indices = @transform_1, window_bounds = array<i64: 8, 1>}, {pipeline_mode = #tpu.pipeline_mode<synchronous>, transform_indices = @transform_2, window_bounds = array<i64: 128, 128>}, {pipeline_mode = #tpu.pipeline_mode<synchronous>, transform_indices = @transform_3, window_bounds = array<i64: 128, 128>}, {pipeline_mode = #tpu.pipeline_mode<synchronous>, transform_indices = @transform_4, window_bounds = array<i64: 1, 128>}, {pipeline_mode = #tpu.pipeline_mode<synchronous>, transform_indices = @transform_5, window_bounds = array<i64: 128, 128>}, {pipeline_mode = #tpu.pipeline_mode<synchronous>, transform_indices = @transform_6, window_bounds = array<i64: 1, 128>}, {transform_indices = @transform_7, window_bounds = array<i64: 8, 128>}]} {
    %c0 = arith.constant 0 : index
    %c0_0 = arith.constant 0 : index
    %0 = vector.load %arg1[%c0, %c0_0] : memref<8x8xi32, #tpu.memory_space<vmem>>, vector<8x8xi32>
    %1 = tpu.iota {dimensions = array<i32: 1>} : vector<8x128xi32>
    %cst = arith.constant 0.000000e+00 : f32
    %2 = vector.broadcast %cst : f32 to vector<8x128xf32>
    %3 = vector.extract_strided_slice %0 {offsets = [0, 0], sizes = [8, 1], strides = [1, 1]} : vector<8x8xi32> to vector<8x1xi32>
    %4 = vector.broadcast %3 : vector<8x1xi32> to vector<8x128xi32>
    %5 = arith.cmpi eq, %4, %1 : vector<8x128xi32>
    %6 = arith.extui %5 : vector<8x128xi1> to vector<8x128xi32>
    %7 = arith.sitofp %6 : vector<8x128xi32> to vector<8x128xf32>
    %8 = arith.addf %2, %7 : vector<8x128xf32>
    %9 = vector.extract_strided_slice %0 {offsets = [0, 1], sizes = [8, 1], strides = [1, 1]} : vector<8x8xi32> to vector<8x1xi32>
    %10 = vector.broadcast %9 : vector<8x1xi32> to vector<8x128xi32>
    %11 = arith.cmpi eq, %10, %1 : vector<8x128xi32>
    %12 = arith.extui %11 : vector<8x128xi1> to vector<8x128xi32>
    %13 = arith.sitofp %12 : vector<8x128xi32> to vector<8x128xf32>
    %14 = arith.addf %8, %13 : vector<8x128xf32>
    %15 = vector.extract_strided_slice %0 {offsets = [0, 2], sizes = [8, 1], strides = [1, 1]} : vector<8x8xi32> to vector<8x1xi32>
    %16 = vector.broadcast %15 : vector<8x1xi32> to vector<8x128xi32>
    %17 = arith.cmpi eq, %16, %1 : vector<8x128xi32>
    %18 = arith.extui %17 : vector<8x128xi1> to vector<8x128xi32>
    %19 = arith.sitofp %18 : vector<8x128xi32> to vector<8x128xf32>
    %20 = arith.addf %14, %19 : vector<8x128xf32>
    %21 = vector.extract_strided_slice %0 {offsets = [0, 3], sizes = [8, 1], strides = [1, 1]} : vector<8x8xi32> to vector<8x1xi32>
    %22 = vector.broadcast %21 : vector<8x1xi32> to vector<8x128xi32>
    %23 = arith.cmpi eq, %22, %1 : vector<8x128xi32>
    %24 = arith.extui %23 : vector<8x128xi1> to vector<8x128xi32>
    %25 = arith.sitofp %24 : vector<8x128xi32> to vector<8x128xf32>
    %26 = arith.addf %20, %25 : vector<8x128xf32>
    %27 = vector.extract_strided_slice %0 {offsets = [0, 4], sizes = [8, 1], strides = [1, 1]} : vector<8x8xi32> to vector<8x1xi32>
    %28 = vector.broadcast %27 : vector<8x1xi32> to vector<8x128xi32>
    %29 = arith.cmpi eq, %28, %1 : vector<8x128xi32>
    %30 = arith.extui %29 : vector<8x128xi1> to vector<8x128xi32>
    %31 = arith.sitofp %30 : vector<8x128xi32> to vector<8x128xf32>
    %32 = arith.addf %26, %31 : vector<8x128xf32>
    %33 = vector.extract_strided_slice %0 {offsets = [0, 5], sizes = [8, 1], strides = [1, 1]} : vector<8x8xi32> to vector<8x1xi32>
    %34 = vector.broadcast %33 : vector<8x1xi32> to vector<8x128xi32>
    %35 = arith.cmpi eq, %34, %1 : vector<8x128xi32>
    %36 = arith.extui %35 : vector<8x128xi1> to vector<8x128xi32>
    %37 = arith.sitofp %36 : vector<8x128xi32> to vector<8x128xf32>
    %38 = arith.addf %32, %37 : vector<8x128xf32>
    %39 = vector.extract_strided_slice %0 {offsets = [0, 6], sizes = [8, 1], strides = [1, 1]} : vector<8x8xi32> to vector<8x1xi32>
    %40 = vector.broadcast %39 : vector<8x1xi32> to vector<8x128xi32>
    %41 = arith.cmpi eq, %40, %1 : vector<8x128xi32>
    %42 = arith.extui %41 : vector<8x128xi1> to vector<8x128xi32>
    %43 = arith.sitofp %42 : vector<8x128xi32> to vector<8x128xf32>
    %44 = arith.addf %38, %43 : vector<8x128xf32>
    %45 = vector.extract_strided_slice %0 {offsets = [0, 7], sizes = [8, 1], strides = [1, 1]} : vector<8x8xi32> to vector<8x1xi32>
    %46 = vector.broadcast %45 : vector<8x1xi32> to vector<8x128xi32>
    %47 = arith.cmpi eq, %46, %1 : vector<8x128xi32>
    %48 = arith.extui %47 : vector<8x128xi1> to vector<8x128xi32>
    %49 = arith.sitofp %48 : vector<8x128xi32> to vector<8x128xf32>
    %50 = arith.addf %44, %49 : vector<8x128xf32>
    %c0_1 = arith.constant 0 : index
    %c0_2 = arith.constant 0 : index
    %51 = vector.load %arg3[%c0_1, %c0_2] : memref<128x128xf32, #tpu.memory_space<vmem>>, vector<128x128xf32>
    %cst_3 = arith.constant dense<0.000000e+00> : vector<8x128xf32>
    %52 = tpu.matmul %50, %51, %cst_3 {dimension_numbers = #tpu.dot_dimension_numbers<[1], [0], [0], [1], [0, 0, 1, 1], [], []>, precision = #tpu.contract_precision<fp32>} : vector<8x128xf32>, vector<128x128xf32>, vector<8x128xf32> -> vector<8x128xf32>
    %c0_4 = arith.constant 0 : index
    %c0_5 = arith.constant 0 : index
    %53 = vector.load %arg2[%c0_4, %c0_5] : memref<8x1xf32, #tpu.memory_space<vmem>>, vector<8x1xf32>
    %54 = vector.broadcast %53 : vector<8x1xf32> to vector<8x128xf32>
    %55 = arith.mulf %52, %54 : vector<8x128xf32>
    %c0_6 = arith.constant 0 : index
    %c0_7 = arith.constant 0 : index
    %56 = vector.load %arg4[%c0_6, %c0_7] : memref<128x128xf32, #tpu.memory_space<vmem>>, vector<128x128xf32>
    %cst_8 = arith.constant dense<0.000000e+00> : vector<8x128xf32>
    %57 = tpu.matmul %55, %56, %cst_8 {dimension_numbers = #tpu.dot_dimension_numbers<[1], [0], [0], [1], [0, 0, 1, 1], [], []>, precision = #tpu.contract_precision<fp32>} : vector<8x128xf32>, vector<128x128xf32>, vector<8x128xf32> -> vector<8x128xf32>
    %c0_9 = arith.constant 0 : index
    %c0_10 = arith.constant 0 : index
    %58 = vector.load %arg5[%c0_9, %c0_10] : memref<1x128xf32, #tpu.memory_space<vmem>>, vector<1x128xf32>
    %59 = vector.broadcast %58 : vector<1x128xf32> to vector<8x128xf32>
    %60 = arith.addf %57, %59 : vector<8x128xf32>
    %cst_11 = arith.constant 0.000000e+00 : f32
    %61 = vector.broadcast %cst_11 : f32 to vector<8x128xf32>
    %62 = arith.maximumf %60, %61 : vector<8x128xf32>
    %c0_12 = arith.constant 0 : index
    %c0_13 = arith.constant 0 : index
    %63 = vector.load %arg6[%c0_12, %c0_13] : memref<128x128xf32, #tpu.memory_space<vmem>>, vector<128x128xf32>
    %cst_14 = arith.constant dense<0.000000e+00> : vector<8x128xf32>
    %64 = tpu.matmul %62, %63, %cst_14 {dimension_numbers = #tpu.dot_dimension_numbers<[1], [0], [0], [1], [0, 0, 1, 1], [], []>, precision = #tpu.contract_precision<fp32>} : vector<8x128xf32>, vector<128x128xf32>, vector<8x128xf32> -> vector<8x128xf32>
    %c0_15 = arith.constant 0 : index
    %c0_16 = arith.constant 0 : index
    %65 = vector.load %arg7[%c0_15, %c0_16] : memref<1x128xf32, #tpu.memory_space<vmem>>, vector<1x128xf32>
    %66 = vector.broadcast %65 : vector<1x128xf32> to vector<8x128xf32>
    %67 = arith.addf %64, %66 : vector<8x128xf32>
    %cst_17 = arith.constant 0.000000e+00 : f32
    %68 = vector.broadcast %cst_17 : f32 to vector<8x128xf32>
    %69 = arith.maximumf %67, %68 : vector<8x128xf32>
    %c0_18 = arith.constant 0 : index
    %c0_19 = arith.constant 0 : index
    %70 = vector.load %arg8[%c0_18, %c0_19] : memref<8x128xf32, #tpu.memory_space<vmem>>, vector<8x128xf32>
    tpu.vector_store %arg8[%c0_18, %c0_19], %69 {strides = array<i32>} : memref<8x128xf32, #tpu.memory_space<vmem>>, vector<8x128xf32>,
    return
  }
  func.func @transform_0(%arg0: i32) -> (i32, i32) {
    %c0_i32 = arith.constant 0 : i32
    %c0_i32_0 = arith.constant 0 : i32
    return %arg0, %c0_i32 : i32, i32
  }
  func.func @transform_1(%arg0: i32) -> (i32, i32) {
    %c0_i32 = arith.constant 0 : i32
    %c0_i32_0 = arith.constant 0 : i32
    return %arg0, %c0_i32 : i32, i32
  }
  func.func @transform_2(%arg0: i32) -> (i32, i32) {
    %c0_i32 = arith.constant 0 : i32
    %c0_i32_0 = arith.constant 0 : i32
    %c0_i32_1 = arith.constant 0 : i32
    return %c0_i32, %c0_i32_0 : i32, i32
  }
  func.func @transform_3(%arg0: i32) -> (i32, i32) {
    %c0_i32 = arith.constant 0 : i32
    %c0_i32_0 = arith.constant 0 : i32
    %c0_i32_1 = arith.constant 0 : i32
    return %c0_i32, %c0_i32_0 : i32, i32
  }
  func.func @transform_4(%arg0: i32) -> (i32, i32) {
    %c0_i32 = arith.constant 0 : i32
    %c0_i32_0 = arith.constant 0 : i32
    %c0_i32_1 = arith.constant 0 : i32
    return %c0_i32, %c0_i32_0 : i32, i32
  }
  func.func @transform_5(%arg0: i32) -> (i32, i32) {
    %c0_i32 = arith.constant 0 : i32
    %c0_i32_0 = arith.constant 0 : i32
    %c0_i32_1 = arith.constant 0 : i32
    return %c0_i32, %c0_i32_0 : i32, i32
  }
  func.func @transform_6(%arg0: i32) -> (i32, i32) {
    %c0_i32 = arith.constant 0 : i32
    %c0_i32_0 = arith.constant 0 : i32
    %c0_i32_1 = arith.constant 0 : i32
    return %c0_i32, %c0_i32_0 : i32, i32
  }
  func.func @transform_7(%arg0: i32) -> (i32, i32) {
    %c0_i32 = arith.constant 0 : i32
    %c0_i32_0 = arith.constant 0 : i32
    return %arg0, %c0_i32 : i32, i32
  }
}

</mosaic_0001>

<bundles_post_ra>
// kernel: tpu_custom_call.1
= control target key start
LH: loop header
LB: loop body
LE: loop exit
PB: predicated region body
PF: predicated region fallthrough
CT: control target
= control target key end

     0   :  { %12 = vsyncpa [#allocation3], 0  ;;  %s2117_s0 = inlined_call_operand.vmem [shape: s32[8,8], index: 0, kind: input, shape index: {}]   ;;  %s2118_s1 = inlined_call_operand.vmem [shape: f32[8,1], index: 1, kind: input, shape index: {}]   ;;  %s2119_s2 = inlined_call_operand.hbm [shape: f32[128,128], index: 2, kind: input, shape index: {}]   ;;  %s2120_s3 = inlined_call_operand.hbm [shape: f32[128,128], index: 3, kind: input, shape index: {}]   ;;  %s2121_s4 = inlined_call_operand.vmem [shape: f32[1,128], index: 4, kind: input, shape index: {}]   ;;  %s2122_s5 = inlined_call_operand.hbm [shape: f32[128,128], index: 5, kind: input, shape index: {}]   ;;  %s2123_s6 = inlined_call_operand.vmem [shape: f32[1,128], index: 6, kind: input, shape index: {}]   ;;  %s2124_s7 = inlined_call_operand.hbm [shape: f32[8,128], index: 7, kind: output, shape index: {}]  }
   0x1   :  { %13 = vsyncpa [#allocation6], 0 }
   0x2   :  { %14 = vsyncpa [#allocation4], 0  ;;  %s36_s26 = sshll.u32 %s2120_s3, 4  ;;  %s1376_s27 = smov [#allocation5]   ;;  %s37_s26 = int_to_ptr.hbm [resolvable:$true] %s36_s26 }
   0x3   :  { %s38_s28 = sshll.u32 %s1376_s27, 4  ;;  %s23_s8 = sshll.u32 %s2119_s2, 4  ;;  %s39_s28 = int_to_ptr.vmem [resolvable:$true] %s38_s28  ;;  %s24_s8 = int_to_ptr.hbm [resolvable:$true] %s23_s8 }
   0x4   :  { %s1377_s9 = smov 128   ;;  %s1378_s10 = smov 8  }
   0x5   :  { %44 = dma.hbm_to_vmem [thread:$0]  %s37_s26, 2048, %s39_s28, [#allocation6], %s1377_s9, %s1377_s9, %s1378_s10  }
   0x6   :  { %s1379_s11 = smov [#allocation2]   ;;  %s51_s15 = sshll.u32 %s2122_s5, 4  ;;  %s52_s15 = int_to_ptr.hbm [resolvable:$true] %s51_s15 }
   0x7   :  { %s25_s12 = sshll.u32 %s1379_s11, 4  ;;  %s1380_s3 = smov [#allocation7]   ;;  %s26_s12 = int_to_ptr.vmem [resolvable:$true] %s25_s12 }
   0x8   :  { %31 = dma.hbm_to_vmem [thread:$0]  %s24_s8, 2048, %s26_s12, [#allocation3], %s1377_s9, %s1377_s9, %s1378_s10  }
   0x9   :  { %s53_s16 = sshll.u32 %s1380_s3, 4  ;;  %s54_s16 = int_to_ptr.vmem [resolvable:$true] %s53_s16 }
   0xa   :  { %59 = dma.hbm_to_vmem [thread:$0]  %s52_s15, 2048, %s54_s16, [#allocation6], %s1377_s9, %s1377_s9, %s1378_s10  }
   0xb   :  { %1370 = dma.done.wait [#allocation3], 2048  }
   0xc   :  { %1371 = vsyncadd [#allocation3], 4294965248 }
   0xd   :  { %1372 = dma.done.wait [#allocation6], 4096  }
   0xe   :  { %1373 = vsyncadd [#allocation6], 4294963200  ;;  %v1381_v0 = vmov 0   ;;  %v1382_v1 = vmov 2   ;;  %v1383_v2 = vmov 4   ;;  %v1444_v3 = vld [vmem:[%s2117_s0] sm:$0xff] }
   0xf   :  { %1263 = vset.pattern.permute.xlu0 %v1381_v0  ;;  %1265 = vset.pattern.permute.xlu1 %v1382_v1  ;;  %v148_v4 = vld [vmem:[#allocation2 + $0x78] sm:$0xff]  ;;  %v147_v5 = vld [vmem:[#allocation2 + $0x70] sm:$0xff]  ;;  %v146_v8 = vld [vmem:[#allocation2 + $0x68] sm:$0xff]  ;;  %v1384_v39 = vmov 1   ;;  %v1385_v40 = vmov 3   ;;  %v1386_v47 = vmov 5  }
  0x10   :  { %1267 = vset.pattern.permute.xlu2 %v1383_v2  ;;  %78 = vperm.xlu0 %1263, %v1444_v3   ;;  %v1448_v6 = vand.u32 4294901760, %v148_v4  ;;  %v1450_v7 = vand.u32 4294901760, %v147_v5  ;;  %v145_v9 = vld [vmem:[#allocation2 + $0x60] sm:$0xff]  ;;  %v144_v10 = vld [vmem:[#allocation2 + $0x58] sm:$0xff]  ;;  %v1453_v11 = vand.u32 4294901760, %v146_v8  ;;  %v143_v14 = vld [vmem:[#allocation2 + $0x50] sm:$0xff] }
  0x11   :  { %92 = vperm.xlu1 %1265, %v1444_v3   ;;  %106 = vperm.xlu2 %1267, %v1444_v3   ;;  %v1455_v12 = vand.u32 4294901760, %v145_v9  ;;  %v1457_v13 = vand.u32 4294901760, %v144_v10  ;;  %v142_v15 = vld [vmem:[#allocation2 + $0x48] sm:$0xff]  ;;  %v141_v16 = vld [vmem:[#allocation2 + $0x40] sm:$0xff]  ;;  %v1466_v19 = vand.u32 4294901760, %v143_v14  ;;  %v140_v37 = vld [vmem:[#allocation2 + $0x38] sm:$0xff] }
  0x12   :  { %v1460_v17 = vsub.f32 %v148_v4, %v1448_v6  ;;  %v1463_v18 = vsub.f32 %v147_v5, %v1450_v7  ;;  %150 = vmatpush.msra.mxu0 %v1448_v6  ;;  %v1468_v20 = vand.u32 4294901760, %v142_v15  ;;  %346 = vmatpush.msra.mxu3 %v1448_v6  ;;  %v1472_v21 = vsub.f32 %v146_v8, %v1453_v11  ;;  %v139_v38 = vld [vmem:[#allocation2 + $0x30] sm:$0xff]  ;;  %v138_v44 = vld [vmem:[#allocation2 + $0x28] sm:$0xff]  ;;  %v137_v46 = vld [vmem:[#allocation2 + $0x20] sm:$0xff]  ;;  %s1390_s20 = smov [#allocation8]   ;;  %s1229_s24 = sshll.u32 %s2124_s7, 4  ;;  %s1230_s24 = int_to_ptr.hbm [resolvable:$true] %s1229_s24 }
  0x13   :  { %v1475_v22 = vsub.f32 %v145_v9, %v1455_v12  ;;  %v1478_v23 = vsub.f32 %v144_v10, %v1457_v13  ;;  %v1480_v24 = vand.u32 4294901760, %v141_v16  ;;  %v1486_v27 = vsub.f32 %v143_v14, %v1466_v19  ;;  %v136_v55 = vld [vmem:[#allocation2 + $0x18] sm:$0xff]  ;;  %v135_v61 = vld [vmem:[#allocation2 + $0x10] sm:$0xff]  ;;  %s1227_s21 = sshll.u32 %s1390_s20, 4  ;;  %s1228_s21 = int_to_ptr.vmem [resolvable:$true] %s1227_s21 }
  0x14   :  { %v192_v25 = vand.u32 4294901760, %v1460_v17  ;;  %v198_v26 = vand.u32 4294901760, %v1463_v18  ;;  %152 = vmatpush.msra.mxu0 %v1450_v7  ;;  %293 = vmatpush.msra.mxu2 %v1460_v17  ;;  %v204_v28 = vand.u32 4294901760, %v1472_v21  ;;  %v1492_v30 = vsub.f32 %v142_v15, %v1468_v20 }
  0x15   :  { %v210_v29 = vand.u32 4294901760, %v1475_v22  ;;  %348 = vmatpush.msra.mxu3 %v1450_v7  ;;  %v216_v33 = vand.u32 4294901760, %v1478_v23  ;;  %v222_v35 = vand.u32 4294901760, %v1486_v27  ;;  %v1509_v36 = vsub.f32 %v141_v16, %v1480_v24 }
  0x16   :  { %v193_v31 = vsub.f32 %v1460_v17, %v192_v25  ;;  %v199_v32 = vsub.f32 %v1463_v18, %v198_v26  ;;  %154 = vmatpush.msra.mxu0 %v1453_v11  ;;  %296 = vmatpush.msra.mxu2 %v1463_v18  ;;  %v205_v34 = vsub.f32 %v1472_v21, %v204_v28  ;;  %v228_v45 = vand.u32 4294901760, %v1492_v30 }
  0x17   :  { %350 = vmatpush.msra.mxu3 %v1453_v11  ;;  %v211_v43 = vsub.f32 %v1475_v22, %v210_v29  ;;  %v217_v49 = vsub.f32 %v1478_v23, %v216_v33  ;;  %v1521_v50 = vand.u32 4294901760, %v140_v37  ;;  %v1523_v51 = vand.u32 4294901760, %v139_v38 }
  0x18   :  { %1264 = vset.pattern.permute.xlu0 %v1384_v39  ;;  %v194_v41 = vand.u32 4294901760, %v193_v31  ;;  %v200_v42 = vand.u32 4294901760, %v199_v32  ;;  %v206_v48 = vand.u32 4294901760, %v205_v34  ;;  %v223_v52 = vsub.f32 %v1486_v27, %v222_v35  ;;  %156 = vmatpush.msra.mxu0 %v1455_v12 }
  0x19   :  { %1266 = vset.pattern.permute.xlu1 %v1385_v40  ;;  %85 = vperm.xlu0 %1264, %v1444_v3   ;;  %v234_v53 = vand.u32 4294901760, %v1509_v36  ;;  %v1531_v54 = vand.u32 4294901760, %v138_v44  ;;  %v212_v56 = vand.u32 4294901760, %v211_v43  ;;  %v1534_v57 = vsub.f32 %v140_v37, %v1521_v50 }
  0x1a   :  { %99 = vperm.xlu1 %1266, %v1444_v3   ;;  %1268 = vset.pattern.permute.xlu2 %v1386_v47  ;;  %v1537_v58 = vsub.f32 %v139_v38, %v1523_v51  ;;  %v1539_v59 = vand.u32 4294901760, %v137_v46  ;;  %v229_v60 = vsub.f32 %v1492_v30, %v228_v45  ;;  %v218_v62 = vand.u32 4294901760, %v217_v49 }
  0x1b   :  { %195 = vmatpush.msra.mxu1 %v194_v41  ;;  %113 = vperm.xlu2 %1268, %v1444_v3   ;;  %v240_v63 = vand.u32 4294901760, %v1534_v57  ;;  %v1549_v1 = vsub.f32 %v138_v44, %v1531_v54  ;;  %v1551_v2 = vand.u32 4294901760, %v136_v55  ;;  %v235_v4 = vsub.f32 %v1509_v36, %v234_v53 }
  0x1c   :  { %299 = vmatpush.msra.mxu2 %v1472_v21  ;;  %158 = vmatpush.msra.mxu0 %v1457_v13  ;;  %v224_v5 = vand.u32 4294901760, %v223_v52  ;;  %v246_v8 = vand.u32 4294901760, %v1537_v58  ;;  %v1561_v9 = vsub.f32 %v137_v46, %v1539_v59  ;;  %v1563_v10 = vand.u32 4294901760, %v135_v61 }
  0x1d   :  { %201 = vmatpush.msra.mxu1 %v200_v42  ;;  %352 = vmatpush.msra.mxu3 %v1455_v12  ;;  %v1387_v14 = vmov 6   ;;  %v230_v15 = vand.u32 4294901760, %v229_v60  ;;  %v241_v16 = vsub.f32 %v1534_v57, %v240_v63  ;;  %v252_v31 = vand.u32 4294901760, %v1549_v1  ;;  %v134_v60 = vld [vmem:[#allocation2 + $0x8] sm:$0xff] }
  0x1e   :  { %302 = vmatpush.msra.mxu2 %v1475_v22  ;;  %160 = vmatpush.msra.mxu0 %v1466_v19  ;;  %v1573_v32 = vsub.f32 %v136_v55, %v1551_v2  ;;  %v1388_v34 = vmov 7   ;;  %v236_v37 = vand.u32 4294901760, %v235_v4  ;;  %v247_v38 = vsub.f32 %v1537_v58, %v246_v8 }
  0x1f   :  { %207 = vmatpush.msra.mxu1 %v206_v48  ;;  %354 = vmatpush.msra.mxu3 %v1457_v13  ;;  %v258_v39 = vand.u32 4294901760, %v1561_v9  ;;  %v1582_v40 = vsub.f32 %v135_v61, %v1563_v10  ;;  %v242_v41 = vand.u32 4294901760, %v241_v16  ;;  %v177_v61 = vand.u32 4294901760, %v134_v60 }
  0x20   :  { %305 = vmatpush.msra.mxu2 %v1478_v23  ;;  %162 = vmatpush.msra.mxu0 %v1468_v20  ;;  %v264_v42 = vand.u32 4294901760, %v1573_v32  ;;  %v248_v43 = vand.u32 4294901760, %v247_v38  ;;  %v1389_v21 = vmov 0.0  }
  0x21   :  { %213 = vmatpush.msra.mxu1 %v212_v56  ;;  %356 = vmatpush.msra.mxu3 %v1466_v19  ;;  %v259_v44 = vsub.f32 %v1561_v9, %v258_v39  ;;  %v270_v46 = vand.u32 4294901760, %v1582_v40  ;;  %v275_v4 = vsub.f32 %v134_v60, %v177_v61 }
  0x22   :  { %1269 = vset.pattern.permute.xlu1 %v1387_v14  ;;  %164 = vmatpush.msra.mxu0 %v1480_v24  ;;  %v265_v48 = vsub.f32 %v1573_v32, %v264_v42 }
  0x23   :  { %120 = vperm.xlu1 %1269, %v1444_v3   ;;  %219 = vmatpush.msra.mxu1 %v218_v62  ;;  %v260_v49 = vand.u32 4294901760, %v259_v44  ;;  %v271_v52 = vsub.f32 %v1582_v40, %v270_v46  ;;  %v133_v62 = vld [vmem:[#allocation2] sm:$0xff] }
  0x24   :  { %1270 = vset.pattern.permute.xlu2 %v1388_v34  ;;  %166 = vmatpush.msra.mxu0 %v1521_v50  ;;  %v266_v55 = vand.u32 4294901760, %v265_v48 }
  0x25   :  { %127 = vperm.xlu2 %1270, %v1444_v3   ;;  %225 = vmatpush.msra.mxu1 %v224_v5  ;;  %v253_v3 = vsub.f32 %v1549_v1, %v252_v31  ;;  %v272_v56 = vand.u32 4294901760, %v271_v52  ;;  %v179_v5 = vand.u32 4294901760, %v133_v62 }
  0x26   :  { %308 = vmatpush.msra.mxu2 %v1486_v27  ;;  %168 = vmatpush.msra.mxu0 %v1523_v51  ;;  %v490_v27 = vld [vmem:[%s2118_s1] sm:$0xff] }
  0x27   :  { %231 = vmatpush.msra.mxu1 %v230_v15  ;;  %358 = vmatpush.msra.mxu3 %v1468_v20  ;;  %v254_v47 = vand.u32 4294901760, %v253_v3  ;;  %v281_v14 = vsub.f32 %v133_v62, %v179_v5  ;;  %v505_v62 = vld [vmem:[#allocation5 + $0x40] sm:$0xff] }
  0x28   :  { %311 = vmatpush.msra.mxu2 %v1492_v30  ;;  %170 = vmatpush.msra.mxu0 %v1531_v54 }
  0x29   :  { %237 = vmatpush.msra.mxu1 %v236_v37  ;;  %360 = vmatpush.msra.mxu3 %v1480_v24  ;;  %v282_v16 = vand.u32 4294901760, %v281_v14 }
  0x2a   :  { %314 = vmatpush.msra.mxu2 %v1509_v36  ;;  %172 = vmatpush.msra.mxu0 %v1539_v59  ;;  %v510_v36 = vld [vmem:[#allocation5 + $0x68] sm:$0xff] }
  0x2b   :  { %243 = vmatpush.msra.mxu1 %v242_v41  ;;  %362 = vmatpush.msra.mxu3 %v1521_v50  ;;  %v283_v37 = vsub.f32 %v281_v14, %v282_v16 }
  0x2c   :  { %317 = vmatpush.msra.mxu2 %v1534_v57  ;;  %174 = vmatpush.msra.mxu0 %v1551_v2 }
  0x2d   :  { %249 = vmatpush.msra.mxu1 %v248_v43  ;;  %364 = vmatpush.msra.mxu3 %v1523_v51  ;;  %v284_v38 = vand.u32 4294901760, %v283_v37 }
  0x2e   :  { %320 = vmatpush.msra.mxu2 %v1537_v58  ;;  %176 = vmatpush.msra.mxu0 %v1563_v10  ;;  %v507_v58 = vld [vmem:[#allocation5 + $0x50] sm:$0xff] }
  0x2f   :  { %255 = vmatpush.msra.mxu1 %v254_v47  ;;  %366 = vmatpush.msra.mxu3 %v1531_v54 }
  0x30   :  { %323 = vmatpush.msra.mxu2 %v1549_v1  ;;  %1271 = vset.pattern.permute.xlu0 %v1381_v0  ;;  %v276_v0 = vand.u32 4294901760, %v275_v4 }
  0x31   :  { %261 = vmatpush.msra.mxu1 %v260_v49  ;;  %368 = vmatpush.msra.mxu3 %v1539_v59 }
  0x32   :  { %326 = vmatpush.msra.mxu2 %v1561_v9  ;;  %178 = vmatpush.msra.mxu0 %v177_v61  ;;  %v277_v15 = vsub.f32 %v275_v4, %v276_v0 }
  0x33   :  { %267 = vmatpush.msra.mxu1 %v266_v55  ;;  %370 = vmatpush.msra.mxu3 %v1551_v2 }
  0x34   :  { %329 = vmatpush.msra.mxu2 %v1573_v32  ;;  %180 = vmatpush.msra.mxu0 %v179_v5  ;;  %v278_v34 = vand.u32 4294901760, %v277_v15 }
  0x35   :  { %273 = vmatpush.msra.mxu1 %v272_v56  ;;  %372 = vmatpush.msra.mxu3 %v1563_v10 }
  0x36   :  { %332 = vmatpush.msra.mxu2 %v1582_v40  ;;  %387 = vmatpush.msrb.mxu0 %v192_v25 }
  0x37   :  { %374 = vmatpush.msra.mxu3 %v177_v61  ;;  %279 = vmatpush.msra.mxu1 %v278_v34  ;;  %v502_v34 = vld [vmem:[#allocation5 + $0x28] sm:$0xff] }
  0x38   :  { %335 = vmatpush.msra.mxu2 %v275_v4  ;;  %391 = vmatpush.msrb.mxu0 %v198_v26  ;;  %v504_v4 = vld [vmem:[#allocation5 + $0x38] sm:$0xff] }
  0x39   :  { %376 = vmatpush.msra.mxu3 %v179_v5  ;;  %285 = vmatpush.msra.mxu1 %v284_v38 }
  0x3a   :  { %338 = vmatpush.msra.mxu2 %v281_v14  ;;  %395 = vmatpush.msrb.mxu0 %v204_v28  ;;  %v512_v28 = vld [vmem:[#allocation5 + $0x78] sm:$0xff] }
  0x3b   :  { %454 = vmatpush.msrb.mxu1 %v1448_v6  ;;  %493 = vperm.xlu0 %1271, %v490_v27  }
  0x3c   :  { %399 = vmatpush.msrb.mxu0 %v210_v29  ;;  %v511_v29 = vld [vmem:[#allocation5 + $0x70] sm:$0xff] }
  0x3d   :  { %456 = vmatpush.msrb.mxu1 %v1450_v7 }
  0x3e   :  { %403 = vmatpush.msrb.mxu0 %v216_v33  ;;  %v1677_v33 = vand.u32 4294901760, %v512_v28 }
  0x3f   :  { %458 = vmatpush.msrb.mxu1 %v1453_v11  ;;  %v75_v11 = vlaneseq }
  0x40   :  { %407 = vmatpush.msrb.mxu0 %v222_v35  ;;  %v1679_v35 = vand.u32 4294901760, %v511_v29  ;;  %518 = vmatpush.msrb.mxu2 %v1677_v33 }
  0x41   :  { %460 = vmatpush.msrb.mxu1 %v1455_v12  ;;  %v1665_v17 = vand.u32 127, %v75_v11 }
  0x42   :  { %411 = vmatpush.msrb.mxu0 %v228_v45  ;;  %v509_v45 = vld [vmem:[#allocation5 + $0x60] sm:$0xff]  ;;  %v1691_v1 = vsub.f32 %v511_v29, %v1679_v35  ;;  %520 = vmatpush.msrb.mxu2 %v1679_v35 }
  0x43   :  { %462 = vmatpush.msrb.mxu1 %v1457_v13 }
  0x44   :  { %415 = vmatpush.msrb.mxu0 %v234_v53  ;;  %v1681_v53 = vand.u32 4294901760, %v510_v36  ;;  %v566_v40 = vand.u32 4294901760, %v1691_v1 }
  0x45   :  { %464 = vmatpush.msrb.mxu1 %v1466_v19 }
  0x46   :  { %419 = vmatpush.msrb.mxu0 %v240_v63  ;;  %v1688_v63 = vsub.f32 %v512_v28, %v1677_v33  ;;  %v567_v52 = vsub.f32 %v1691_v1, %v566_v40  ;;  %522 = vmatpush.msrb.mxu2 %v1681_v53 }
  0x47   :  { %466 = vmatpush.msrb.mxu1 %v1468_v20 }
  0x48   :  { %423 = vmatpush.msrb.mxu0 %v246_v8  ;;  %v568_v14 = vand.u32 4294901760, %v567_v52  ;;  %v498_v52 = vld [vmem:[#allocation5 + $0x8] sm:$0xff] }
  0x49   :  { %468 = vmatpush.msrb.mxu1 %v1480_v24 }
  0x4a   :  { %427 = vmatpush.msrb.mxu0 %v252_v31 }
  0x4b   :  { %470 = vmatpush.msrb.mxu1 %v1521_v50  ;;  %v508_v50 = vld [vmem:[#allocation5 + $0x58] sm:$0xff] }
  0x4c   :  { %431 = vmatpush.msrb.mxu0 %v258_v39  ;;  %v1685_v57 = vand.u32 4294901760, %v508_v50  ;;  %v560_v39 = vand.u32 4294901760, %v1688_v63 }
  0x4d   :  { %472 = vmatpush.msrb.mxu1 %v1523_v51 }
  0x4e   :  { %435 = vmatpush.msrb.mxu0 %v264_v42  ;;  %v1705_v32 = vsub.f32 %v508_v50, %v1685_v57  ;;  %v561_v49 = vsub.f32 %v1688_v63, %v560_v39 }
  0x4f   :  { %474 = vmatpush.msrb.mxu1 %v1531_v54  ;;  %v1683_v54 = vand.u32 4294901760, %v509_v45 }
  0x50   :  { %439 = vmatpush.msrb.mxu0 %v270_v46  ;;  %v584_v47 = vand.u32 4294901760, %v1705_v32 }
  0x51   :  { %476 = vmatpush.msrb.mxu1 %v1539_v59  ;;  %v506_v59 = vld [vmem:[#allocation5 + $0x48] sm:$0xff]  ;;  %v1702_v31 = vsub.f32 %v509_v45, %v1683_v54  ;;  %524 = vmatpush.msrb.mxu2 %v1683_v54 }
  0x52   :  { %443 = vmatpush.msrb.mxu0 %v276_v0  ;;  %v1696_v8 = vand.u32 4294901760, %v506_v59  ;;  %v562_v0 = vand.u32 4294901760, %v561_v49  ;;  %v585_v38 = vsub.f32 %v1705_v32, %v584_v47 }
  0x53   :  { %478 = vmatpush.msrb.mxu1 %v1551_v2  ;;  %v1694_v2 = vand.u32 4294901760, %v507_v58  ;;  %v578_v46 = vand.u32 4294901760, %v1702_v31  ;;  %526 = vmatpush.msrb.mxu2 %v1685_v57 }
  0x54   :  { %447 = vmatpush.msrb.mxu0 %v282_v16  ;;  %v1714_v3 = vsub.f32 %v506_v59, %v1696_v8  ;;  %v503_v16 = vld [vmem:[#allocation5 + $0x30] sm:$0xff]  ;;  %563 = vmatpush.msrb.mxu3 %v562_v0  ;;  %v586_v27 = vand.u32 4294901760, %v585_v38 }
  0x55   :  { %480 = vmatpush.msrb.mxu1 %v1563_v10  ;;  %v1699_v10 = vsub.f32 %v510_v36, %v1681_v53  ;;  %v1711_v41 = vsub.f32 %v507_v58, %v1694_v2  ;;  %v579_v15 = vsub.f32 %v1702_v31, %v578_v46  ;;  %528 = vmatpush.msrb.mxu2 %v1694_v2 }
  0x56   :  { %569 = vmatpush.msrb.mxu3 %v568_v14 }
  0x57   :  { %482 = vmatpush.msrb.mxu1 %v177_v61  ;;  %v572_v44 = vand.u32 4294901760, %v1699_v10  ;;  %v590_v61 = vand.u32 4294901760, %v1711_v41  ;;  %530 = vmatpush.msrb.mxu2 %v1696_v8 }
  0x59   :  { %484 = vmatpush.msrb.mxu1 %v179_v5  ;;  %v573_v60 = vsub.f32 %v1699_v10, %v572_v44 }
  0x5b   :  { %v574_v11 = vand.u32 4294901760, %v573_v60 }
  0x5d   :  { %575 = vmatpush.msrb.mxu3 %v574_v11 }
  0x6b   :  { %v107_v6 = vpop.permute.xlu2 %106 }
  0x6c   :  { %vm108_vm2 = vcmp.eq.s32.totalorder %v107_v6, %v1665_v17  ;;  %v596_v6 = vand.u32 4294901760, %v1714_v3 }
  0x6d   :  { %v1244_v25 = vsel %vm108_vm2, 1.0, %v1389_v21 }
  0x6e   :  { %v597_v28 = vsub.f32 %v1714_v3, %v596_v6 }
  0x75   :  { %v114_v7 = vpop.permute.xlu2 %113 }
  0x76   :  { %vm115_vm5 = vcmp.eq.s32.totalorder %v114_v7, %v1665_v17  ;;  %v501_v7 = vld [vmem:[#allocation5 + $0x20] sm:$0xff] }
  0x77   :  { %v1245_v48 = vsel %vm115_vm5, 1.0, %v1389_v21 }
  0x7f   :  { %v128_v20 = vpop.permute.xlu2 %127 }
  0x80   :  { %vm129_vm6 = vcmp.eq.s32.totalorder %v128_v20, %v1665_v17  ;;  %v1753_v20 = vand.u32 4294901760, %v502_v34 }
  0x81   :  { %v1247_v5 = vsel %vm129_vm6, 1.0, %v1389_v21 }
  0x82   :  { %v79_v12 = vpop.permute.xlu0 %78  ;;  %v1776_v50 = vsub.f32 %v502_v34, %v1753_v20 }
  0x83   :  { %v93_v13 = vpop.permute.xlu1 %92  ;;  %vm80_vm0 = vcmp.eq.s32.totalorder %v79_v12, %v1665_v17  ;;  %v1743_v12 = vand.u32 4294901760, %v505_v62 }
  0x84   :  { %vm94_vm1 = vcmp.eq.s32.totalorder %v93_v13, %v1665_v17  ;;  %v1240_v22 = vsel %vm80_vm0, 1.0, %v1389_v21  ;;  %v1746_v13 = vand.u32 4294901760, %v504_v4  ;;  %v620_v60 = vand.u32 4294901760, %v1776_v50 }
  0x85   :  { %v1242_v24 = vsel %vm94_vm1, 1.0, %v1389_v21  ;;  %532 = vmatpush.msrb.mxu2 %v1743_v12 }
  0x86   :  { %v621_v38 = vsub.f32 %v1776_v50, %v620_v60 }
  0x87   :  { %534 = vmatpush.msrb.mxu2 %v1746_v13 }
  0x8b   :  { %v86_v18 = vpop.permute.xlu0 %85 }
  0x8c   :  { %v100_v19 = vpop.permute.xlu1 %99  ;;  %vm87_vm3 = vcmp.eq.s32.totalorder %v86_v18, %v1665_v17  ;;  %v591_v18 = vsub.f32 %v1711_v41, %v590_v61 }
  0x8d   :  { %vm101_vm4 = vcmp.eq.s32.totalorder %v100_v19, %v1665_v17  ;;  %v1241_v23 = vsel %vm87_vm3, 1.0, %v1389_v21  ;;  %v1751_v19 = vand.u32 4294901760, %v503_v16 }
  0x8e   :  { %v90_v26 = vadd.f32 %v1241_v23, %v1240_v22  ;;  %v1243_v30 = vsel %vm101_vm4, 1.0, %v1389_v21  ;;  %v580_v22 = vand.u32 4294901760, %v579_v15  ;;  %v1756_v23 = vsub.f32 %v505_v62, %v1743_v12 }
  0x8f   :  { %v1770_v29 = vsub.f32 %v503_v16, %v1751_v19  ;;  %536 = vmatpush.msrb.mxu2 %v1751_v19  ;;  %v1810_v16 = vand.u32 4294901760, %v498_v52 }
  0x90   :  { %v97_v51 = vadd.f32 %v1242_v24, %v90_v26  ;;  %v1759_v24 = vsub.f32 %v504_v4, %v1746_v13  ;;  %v602_v36 = vand.u32 4294901760, %v1756_v23  ;;  %581 = vmatpush.msrb.mxu3 %v580_v22  ;;  %v622_v22 = vand.u32 4294901760, %v621_v38  ;;  %v865_v38 = vld [vmem:[#allocation7 + $0x30] sm:$0xff] }
  0x91   :  { %538 = vmatpush.msrb.mxu2 %v1753_v20  ;;  %v1819_v11 = vsub.f32 %v498_v52, %v1810_v16 }
  0x92   :  { %v104_v9 = vadd.f32 %v1243_v30, %v97_v51  ;;  %v499_v30 = vld [vmem:[#allocation5 + $0x10] sm:$0xff]  ;;  %v608_v45 = vand.u32 4294901760, %v1759_v24  ;;  %587 = vmatpush.msrb.mxu3 %v586_v27 }
  0x94   :  { %v111_v42 = vadd.f32 %v1244_v25, %v104_v9  ;;  %v1762_v25 = vand.u32 4294901760, %v501_v7  ;;  %v592_v9 = vand.u32 4294901760, %v591_v18 }
  0x95   :  { %v121_v43 = vpop.permute.xlu1 %120 }
  0x96   :  { %vm122_vm7 = vcmp.eq.s32.totalorder %v121_v43, %v1665_v17  ;;  %v118_v55 = vadd.f32 %v1245_v48, %v111_v42  ;;  %v1783_v59 = vsub.f32 %v501_v7, %v1762_v25  ;;  %v603_v42 = vsub.f32 %v1756_v23, %v602_v36  ;;  %593 = vmatpush.msrb.mxu3 %v592_v9 }
  0x97   :  { %v1246_v56 = vsel %vm122_vm7, 1.0, %v1389_v21  ;;  %v500_v21 = vld [vmem:[#allocation5 + $0x18] sm:$0xff]  ;;  %v614_v43 = vand.u32 4294901760, %v1770_v29  ;;  %v1790_v48 = vand.u32 4294901760, %v499_v30  ;;  %540 = vmatpush.msrb.mxu2 %v1762_v25 }
  0x98   :  { %v125_v37 = vadd.f32 %v1246_v56, %v118_v55  ;;  %v1778_v51 = vand.u32 4294901760, %v500_v21  ;;  %v598_v55 = vand.u32 4294901760, %v597_v28  ;;  %v609_v56 = vsub.f32 %v1759_v24, %v608_v45 }
  0x99   :  { %v604_v0 = vand.u32 4294901760, %v603_v42  ;;  %v615_v14 = vsub.f32 %v1770_v29, %v614_v43  ;;  %v1808_v15 = vsub.f32 %v499_v30, %v1790_v48  ;;  %v644_v28 = vand.u32 4294901760, %v1819_v11 }
  0x9a   :  { %v132_v17 = vadd.f32 %v1247_v5, %v125_v37  ;;  %v1799_v62 = vsub.f32 %v500_v21, %v1778_v51  ;;  %v626_v5 = vand.u32 4294901760, %v1783_v59  ;;  %599 = vmatpush.msrb.mxu3 %v598_v55  ;;  %v610_v37 = vand.u32 4294901760, %v609_v56  ;;  %542 = vmatpush.msrb.mxu2 %v1778_v51 }
  0x9b   :  { %v638_v21 = vand.u32 4294901760, %v1808_v15  ;;  %v645_v42 = vsub.f32 %v1819_v11, %v644_v28 }
  0x9c   :  { %v1764_v26 = vand.u32 4294901760, %v132_v17  ;;  %v632_v7 = vand.u32 4294901760, %v1799_v62  ;;  %605 = vmatpush.msrb.mxu3 %v604_v0  ;;  %v627_v18 = vsub.f32 %v1783_v59, %v626_v5  ;;  %544 = vmatpush.msrb.mxu2 %v1790_v48 }
  0x9d   :  { %v646_v52 = vand.u32 4294901760, %v645_v42 }
  0x9e   :  { %287 = vmatmul.f32.vlgmr.msra.gmra.mxu1 %v1764_v26  ;;  %v182_v58 = vsub.f32 %v132_v17, %v1764_v26  ;;  %v616_v17 = vand.u32 4294901760, %v615_v14  ;;  %611 = vmatpush.msrb.mxu3 %v610_v37  ;;  %v633_v27 = vsub.f32 %v1799_v62, %v632_v7  ;;  %v628_v30 = vand.u32 4294901760, %v627_v18  ;;  %v866_v37 = vld [vmem:[#allocation7 + $0x38] sm:$0xff] }
  0x9f   :  { %714 = vmatpush.msra.mxu1 %v1677_v33  ;;  %546 = vmatpush.msrb.mxu2 %v1810_v16  ;;  %v1980_v42 = vand.u32 4294901760, %v866_v37 }
  0xa0   :  { %341 = vmatmul.f32.vlgmr.msra.gmra.mxu2 %v182_v58  ;;  %v183_v49 = vand.u32 4294901760, %v182_v58  ;;  %617 = vmatpush.msrb.mxu3 %v616_v17  ;;  %v634_v9 = vand.u32 4294901760, %v633_v27 }
  0xa1   :  { %716 = vmatpush.msra.mxu1 %v1679_v35 }
  0xa2   :  { %380 = vmatmul.f32.vlgmr.msra.gmra.mxu3 %v183_v49  ;;  %v184_v4 = vsub.f32 %v182_v58, %v183_v49  ;;  %v639_v58 = vsub.f32 %v1808_v15, %v638_v21 }
  0xa3   :  { %718 = vmatpush.msra.mxu1 %v1681_v53  ;;  %623 = vmatpush.msrb.mxu3 %v622_v22 }
  0xa4   :  { %v185_v34 = vand.u32 4294901760, %v184_v4  ;;  %v640_v49 = vand.u32 4294901760, %v639_v58 }
  0xa5   :  { %720 = vmatpush.msra.mxu1 %v1683_v54  ;;  %629 = vmatpush.msrb.mxu3 %v628_v30  ;;  %v863_v30 = vld [vmem:[#allocation7 + $0x20] sm:$0xff] }
  0xa6   :  { %186 = vmatmul.f32.vlgmr.msra.gmra.mxu0 %v185_v34  ;;  %486 = vmatmul.f32.vlgmr.msrb.gmra.mxu1 %v1764_v26 }
  0xa7   :  { %661 = vmatpush.msra.mxu0 %v1688_v63  ;;  %722 = vmatpush.msra.mxu1 %v1685_v57  ;;  %v872_v63 = vld [vmem:[#allocation7 + $0x68] sm:$0xff] }
  0xa8   :  { %635 = vmatpush.msrb.mxu3 %v634_v9 }
  0xa9   :  { %664 = vmatpush.msra.mxu0 %v1691_v1  ;;  %724 = vmatpush.msra.mxu1 %v1694_v2 }
  0xaa   :  { %641 = vmatpush.msrb.mxu3 %v640_v49  ;;  %v1982_v49 = vand.u32 4294901760, %v865_v38 }
  0xab   :  { %667 = vmatpush.msra.mxu0 %v1699_v10  ;;  %726 = vmatpush.msra.mxu1 %v1696_v8  ;;  %v1917_v10 = vand.u32 4294901760, %v872_v63 }
  0xac   :  { %647 = vmatpush.msrb.mxu3 %v646_v52 }
  0xad   :  { %670 = vmatpush.msra.mxu0 %v1702_v31  ;;  %728 = vmatpush.msra.mxu1 %v1743_v12  ;;  %v871_v31 = vld [vmem:[#allocation7 + $0x60] sm:$0xff] }
  0xae   :  { %449 = vmatmul.f32.vlgmr.msrb.gmra.mxu0 %v1764_v26  ;;  %v497_v26 = vld [vmem:[#allocation5] sm:$0xff] }
  0xaf   :  { %673 = vmatpush.msra.mxu0 %v1705_v32  ;;  %730 = vmatpush.msra.mxu1 %v1746_v13  ;;  %v547_v55 = vand.u32 4294901760, %v497_v26  ;;  %v870_v32 = vld [vmem:[#allocation7 + $0x58] sm:$0xff] }
  0xb1   :  { %676 = vmatpush.msra.mxu0 %v1711_v41  ;;  %732 = vmatpush.msra.mxu1 %v1751_v19  ;;  %v649_v56 = vsub.f32 %v497_v26, %v547_v55  ;;  %v1919_v41 = vand.u32 4294901760, %v871_v31 }
  0xb2   :  { %548 = vmatpush.msrb.mxu2 %v547_v55 }
  0xb3   :  { %679 = vmatpush.msra.mxu0 %v1714_v3  ;;  %734 = vmatpush.msra.mxu1 %v1753_v20  ;;  %v650_v4 = vand.u32 4294901760, %v649_v56  ;;  %v1921_v3 = vand.u32 4294901760, %v870_v32 }
  0xb4   :  { %755 = vmatpush.msra.mxu2 %v560_v39  ;;  %v869_v39 = vld [vmem:[#allocation7 + $0x50] sm:$0xff] }
  0xb5   :  { %682 = vmatpush.msra.mxu0 %v1756_v23  ;;  %736 = vmatpush.msra.mxu1 %v1762_v25  ;;  %v651_v0 = vsub.f32 %v649_v56, %v650_v4  ;;  %v867_v23 = vld [vmem:[#allocation7 + $0x40] sm:$0xff] }
  0xb6   :  { %759 = vmatpush.msra.mxu2 %v566_v40 }
  0xb7   :  { %685 = vmatpush.msra.mxu0 %v1759_v24  ;;  %738 = vmatpush.msra.mxu1 %v1778_v51  ;;  %v652_v14 = vand.u32 4294901760, %v651_v0 }
  0xb8   :  { %763 = vmatpush.msra.mxu2 %v572_v44  ;;  %v1923_v44 = vand.u32 4294901760, %v869_v39 }
  0xb9   :  { %688 = vmatpush.msra.mxu0 %v1770_v29  ;;  %740 = vmatpush.msra.mxu1 %v1790_v48 }
  0xba   :  { %767 = vmatpush.msra.mxu2 %v578_v46  ;;  %653 = vmatpush.msrb.mxu3 %v652_v14  ;;  %v868_v46 = vld [vmem:[#allocation7 + $0x48] sm:$0xff]  ;;  %v1991_v14 = vsub.f32 %v866_v37, %v1980_v42 }
  0xbb   :  { %691 = vmatpush.msra.mxu0 %v1776_v50  ;;  %742 = vmatpush.msra.mxu1 %v1810_v16 }
  0xbc   :  { %822 = vmatpush.msra.mxu3 %v1677_v33  ;;  %771 = vmatpush.msra.mxu2 %v584_v47 }
  0xbd   :  { %694 = vmatpush.msra.mxu0 %v1783_v59  ;;  %744 = vmatpush.msra.mxu1 %v547_v55 }
  0xbe   :  { %824 = vmatpush.msra.mxu3 %v1679_v35  ;;  %775 = vmatpush.msra.mxu2 %v590_v61 }
  0xbf   :  { %697 = vmatpush.msra.mxu0 %v1799_v62 }
  0xc0   :  { %826 = vmatpush.msra.mxu3 %v1681_v53  ;;  %779 = vmatpush.msra.mxu2 %v596_v6  ;;  %v1932_v6 = vsub.f32 %v872_v63, %v1917_v10  ;;  %v970_v63 = vand.u32 4294901760, %v1991_v14 }
  0xc1   :  { %700 = vmatpush.msra.mxu0 %v1808_v15 }
  0xc2   :  { %828 = vmatpush.msra.mxu3 %v1683_v54  ;;  %783 = vmatpush.msra.mxu2 %v602_v36  ;;  %v874_v54 = vld [vmem:[#allocation7 + $0x78] sm:$0xff]  ;;  %v934_v36 = vand.u32 4294901760, %v1932_v6 }
  0xc3   :  { %703 = vmatpush.msra.mxu0 %v1819_v11  ;;  %v494_v11 = vpop.permute.xlu0 %493 }
  0xc4   :  { %830 = vmatpush.msra.mxu3 %v1685_v57  ;;  %787 = vmatpush.msra.mxu2 %v608_v45  ;;  %v873_v57 = vld [vmem:[#allocation7 + $0x70] sm:$0xff]  ;;  %v935_v62 = vsub.f32 %v1932_v6, %v934_v36 }
  0xc5   :  { %706 = vmatpush.msra.mxu0 %v649_v56 }
  0xc6   :  { %832 = vmatpush.msra.mxu3 %v1694_v2  ;;  %791 = vmatpush.msra.mxu2 %v614_v43  ;;  %v1913_v2 = vand.u32 4294901760, %v874_v54  ;;  %v936_v58 = vand.u32 4294901760, %v935_v62 }
  0xc8   :  { %834 = vmatpush.msra.mxu3 %v1696_v8  ;;  %795 = vmatpush.msra.mxu2 %v620_v60  ;;  %v1915_v8 = vand.u32 4294901760, %v873_v57  ;;  %v1926_v47 = vsub.f32 %v874_v54, %v1913_v2 }
  0xc9   :  { %880 = vmatpush.msrb.mxu0 %v1913_v2 }
  0xca   :  { %836 = vmatpush.msra.mxu3 %v1743_v12  ;;  %799 = vmatpush.msra.mxu2 %v626_v5  ;;  %v1929_v61 = vsub.f32 %v873_v57, %v1915_v8  ;;  %v1935_v12 = vand.u32 4294901760, %v868_v46  ;;  %v1965_v5 = vand.u32 4294901760, %v867_v23 }
  0xcb   :  { %882 = vmatpush.msrb.mxu0 %v1915_v8 }
  0xcc   :  { %838 = vmatpush.msra.mxu3 %v1746_v13  ;;  %803 = vmatpush.msra.mxu2 %v632_v7  ;;  %v1938_v13 = vsub.f32 %v871_v31, %v1919_v41  ;;  %v928_v29 = vand.u32 4294901760, %v1929_v61  ;;  %v1953_v59 = vsub.f32 %v868_v46, %v1935_v12  ;;  %v1977_v9 = vsub.f32 %v867_v23, %v1965_v5 }
  0xcd   :  { %884 = vmatpush.msrb.mxu0 %v1917_v10 }
  0xce   :  { %840 = vmatpush.msra.mxu3 %v1751_v19  ;;  %807 = vmatpush.msra.mxu2 %v638_v21  ;;  %v1941_v19 = vsub.f32 %v870_v32, %v1921_v3  ;;  %v940_v50 = vand.u32 4294901760, %v1938_v13  ;;  %v929_v60 = vsub.f32 %v1929_v61, %v928_v29  ;;  %v864_v21 = vld [vmem:[#allocation7 + $0x28] sm:$0xff]  ;;  %v964_v0 = vand.u32 4294901760, %v1977_v9 }
  0xcf   :  { %886 = vmatpush.msrb.mxu0 %v1919_v41  ;;  %v1987_v56 = vand.u32 4294901760, %v864_v21 }
  0xd0   :  { %842 = vmatpush.msra.mxu3 %v1753_v20  ;;  %811 = vmatpush.msra.mxu2 %v644_v28  ;;  %v1944_v20 = vsub.f32 %v869_v39, %v1923_v44  ;;  %v930_v18 = vand.u32 4294901760, %v929_v60  ;;  %v958_v28 = vand.u32 4294901760, %v1953_v59 }
  0xd1   :  { %888 = vmatpush.msrb.mxu0 %v1921_v3 }
  0xd2   :  { %844 = vmatpush.msra.mxu3 %v1762_v25  ;;  %815 = vmatpush.msra.mxu2 %v650_v4  ;;  %v922_v25 = vand.u32 4294901760, %v1926_v47  ;;  %v952_v34 = vand.u32 4294901760, %v1944_v20  ;;  %v862_v4 = vld [vmem:[#allocation7 + $0x18] sm:$0xff]  ;;  %v959_v54 = vsub.f32 %v1953_v59, %v958_v28 }
  0xd3   :  { %890 = vmatpush.msrb.mxu0 %v1923_v44  ;;  %v2007_v31 = vand.u32 4294901760, %v862_v4 }
  0xd4   :  { %846 = vmatpush.msra.mxu3 %v1778_v51  ;;  %v946_v51 = vand.u32 4294901760, %v1941_v19 }
  0xd5   :  { %892 = vmatpush.msrb.mxu0 %v1935_v12  ;;  %v2024_v60 = vsub.f32 %v862_v4, %v2007_v31 }
  0xd6   :  { %848 = vmatpush.msra.mxu3 %v1790_v48  ;;  %v923_v48 = vsub.f32 %v1926_v47, %v922_v25  ;;  %v947_v27 = vsub.f32 %v1941_v19, %v946_v51 }
  0xd7   :  { %894 = vmatpush.msrb.mxu0 %v1965_v5 }
  0xd8   :  { %850 = vmatpush.msra.mxu3 %v1810_v16  ;;  %v941_v16 = vsub.f32 %v1938_v13, %v940_v50  ;;  %v924_v17 = vand.u32 4294901760, %v923_v48  ;;  %v948_v57 = vand.u32 4294901760, %v947_v27 }
  0xd9   :  { %896 = vmatpush.msrb.mxu0 %v1980_v42 }
  0xda   :  { %852 = vmatpush.msra.mxu3 %v547_v55  ;;  %925 = vmatpush.msrb.mxu1 %v924_v17  ;;  %v942_v26 = vand.u32 4294901760, %v941_v16  ;;  %v953_v55 = vsub.f32 %v1944_v20, %v952_v34  ;;  %v994_v17 = vand.u32 4294901760, %v2024_v60 }
  0xdb   :  { %898 = vmatpush.msrb.mxu0 %v1982_v49 }
  0xdc   :  { %931 = vmatpush.msrb.mxu1 %v930_v18  ;;  %v954_v39 = vand.u32 4294901760, %v953_v55  ;;  %v995_v27 = vsub.f32 %v2024_v60, %v994_v17  ;;  %v860_v55 = vld [vmem:[#allocation7 + $0x8] sm:$0xff] }
  0xdd   :  { %900 = vmatpush.msrb.mxu0 %v1987_v56 }
  0xde   :  { %937 = vmatpush.msrb.mxu1 %v936_v58  ;;  %v996_v58 = vand.u32 4294901760, %v995_v27 }
  0xe0   :  { %943 = vmatpush.msrb.mxu1 %v942_v26 }
  0xe2   :  { %949 = vmatpush.msrb.mxu1 %v948_v57 }
  0xe4   :  { %955 = vmatpush.msrb.mxu1 %v954_v39 }
 0x11b   :  { %v288_v33 = vpop.f32.mrf.mxu1 }
 0x123   :  { %v187_v35 = vpop.f32.mrf.mxu0  ;;  %v342_v1 = vpop.f32.mrf.mxu2 }
 0x124   :  { %v289_v53 = vadd.f32 %v288_v33, %v187_v35  ;;  %v487_v7 = vpop.f32.mrf.mxu1  ;;  %v1995_v33 = vsub.f32 %v865_v38, %v1982_v49  ;;  %v1997_v35 = vand.u32 4294901760, %v863_v30 }
 0x125   :  { %v381_v24 = vpop.f32.mrf.mxu3 }
 0x126   :  { %v343_v40 = vadd.f32 %v342_v1, %v289_v53  ;;  %v2005_v1 = vsub.f32 %v864_v21, %v1987_v56  ;;  %v976_v46 = vand.u32 4294901760, %v1995_v33  ;;  %v2015_v23 = vsub.f32 %v863_v30, %v1997_v35  ;;  %902 = vmatpush.msrb.mxu0 %v1997_v35 }
 0x128   :  { %v382_v45 = vadd.f32 %v381_v24, %v343_v40  ;;  %v965_v40 = vsub.f32 %v1977_v9, %v964_v0  ;;  %v982_v48 = vand.u32 4294901760, %v2005_v1  ;;  %v977_v16 = vsub.f32 %v1995_v33, %v976_v46  ;;  %904 = vmatpush.msrb.mxu0 %v2007_v31 }
 0x129   :  { %v988_v37 = vand.u32 4294901760, %v2015_v23 }
 0x12a   :  { %v978_v18 = vand.u32 4294901760, %v977_v16 }
 0x12b   :  { %v450_v43 = vpop.f32.mrf.mxu0  ;;  %v989_v21 = vsub.f32 %v2015_v23, %v988_v37 }
 0x12c   :  { %v451_v15 = vadd.f32 %v450_v43, %v382_v45  ;;  %v960_v45 = vand.u32 4294901760, %v959_v54  ;;  %v971_v43 = vsub.f32 %v1991_v14, %v970_v63  ;;  %v859_v54 = vld [vmem:[#allocation7] sm:$0xff] }
 0x12d   :  { %v990_v30 = vand.u32 4294901760, %v989_v21  ;;  %v909_v39 = vand.u32 4294901760, %v859_v54 }
 0x12e   :  { %v488_v22 = vadd.f32 %v487_v7, %v451_v15  ;;  %v966_v15 = vand.u32 4294901760, %v965_v40  ;;  %961 = vmatpush.msrb.mxu1 %v960_v45  ;;  %v972_v7 = vand.u32 4294901760, %v971_v43 }
 0x12f   :  { %v1011_v45 = vsub.f32 %v859_v54, %v909_v39 }
 0x130   :  { %v496_v52 = vmul.f32 %v494_v11, %v488_v22  ;;  %v983_v11 = vsub.f32 %v2005_v1, %v982_v48  ;;  %967 = vmatpush.msrb.mxu1 %v966_v15 }
 0x131   :  { %v1012_v15 = vand.u32 4294901760, %v1011_v45 }
 0x132   :  { %v549_v53 = vand.u32 4294901760, %v496_v52  ;;  %973 = vmatpush.msrb.mxu1 %v972_v7  ;;  %v984_v22 = vand.u32 4294901760, %v983_v11 }
 0x134   :  { %v550_v32 = vsub.f32 %v496_v52, %v549_v53  ;;  %655 = vmatmul.f32.vlgmr.msrb.gmra.mxu3 %v549_v53  ;;  %979 = vmatpush.msrb.mxu1 %v978_v18  ;;  %v861_v52 = vld [vmem:[#allocation7 + $0x10] sm:$0xff] }
 0x135   :  { %1076 = vmatpush.msrb.mxu3 %v1913_v2  ;;  %v905_v26 = vand.u32 4294901760, %v861_v52 }
 0x136   :  { %v551_v24 = vand.u32 4294901760, %v550_v32  ;;  %709 = vmatmul.f32.vlgmr.msra.gmra.mxu0 %v550_v32  ;;  %985 = vmatpush.msrb.mxu1 %v984_v22 }
 0x137   :  { %1078 = vmatpush.msrb.mxu3 %v1915_v8  ;;  %v999_v4 = vsub.f32 %v861_v52, %v905_v26  ;;  %906 = vmatpush.msrb.mxu0 %v905_v26 }
 0x138   :  { %748 = vmatmul.f32.vlgmr.msra.gmra.mxu1 %v551_v24  ;;  %v552_v62 = vsub.f32 %v550_v32, %v551_v24 }
 0x139   :  { %1080 = vmatpush.msrb.mxu3 %v1917_v10  ;;  %991 = vmatpush.msrb.mxu1 %v990_v30  ;;  %v1000_v57 = vand.u32 4294901760, %v999_v4 }
 0x13a   :  { %v553_v38 = vand.u32 4294901760, %v552_v62 }
 0x13b   :  { %1082 = vmatpush.msrb.mxu3 %v1919_v41  ;;  %997 = vmatpush.msrb.mxu1 %v996_v58  ;;  %v1001_v40 = vsub.f32 %v999_v4, %v1000_v57 }
 0x13c   :  { %554 = vmatmul.f32.vlgmr.msrb.gmra.mxu2 %v553_v38  ;;  %854 = vmatmul.f32.vlgmr.msra.gmra.mxu3 %v549_v53  ;;  %v1013_v38 = vsub.f32 %v1011_v45, %v1012_v15 }
 0x13d   :  { %1023 = vmatpush.msrb.mxu2 %v1926_v47  ;;  %1084 = vmatpush.msrb.mxu3 %v1921_v3  ;;  %v1002_v43 = vand.u32 4294901760, %v1001_v40 }
 0x13e   :  { %v1014_v7 = vand.u32 4294901760, %v1013_v38 }
 0x13f   :  { %1026 = vmatpush.msrb.mxu2 %v1929_v61  ;;  %1086 = vmatpush.msrb.mxu3 %v1923_v44 }
 0x140   :  { %1003 = vmatpush.msrb.mxu1 %v1002_v43 }
 0x141   :  { %1029 = vmatpush.msrb.mxu2 %v1932_v6  ;;  %1088 = vmatpush.msrb.mxu3 %v1935_v12 }
 0x143   :  { %1032 = vmatpush.msrb.mxu2 %v1938_v13  ;;  %1090 = vmatpush.msrb.mxu3 %v1965_v5 }
 0x144   :  { %817 = vmatmul.f32.vlgmr.msra.gmra.mxu2 %v549_v53  ;;  %v907_v53 = vand.u32 4294901760, %v860_v55 }
 0x145   :  { %1035 = vmatpush.msrb.mxu2 %v1941_v19  ;;  %1092 = vmatpush.msrb.mxu3 %v1980_v42 }
 0x146   :  { %v1005_v32 = vsub.f32 %v860_v55, %v907_v53  ;;  %908 = vmatpush.msrb.mxu0 %v907_v53 }
 0x147   :  { %1038 = vmatpush.msrb.mxu2 %v1944_v20  ;;  %1094 = vmatpush.msrb.mxu3 %v1982_v49 }
 0x148   :  { %v1006_v24 = vand.u32 4294901760, %v1005_v32  ;;  %910 = vmatpush.msrb.mxu0 %v909_v39 }
 0x149   :  { %1041 = vmatpush.msrb.mxu2 %v1953_v59  ;;  %1096 = vmatpush.msrb.mxu3 %v1987_v56 }
 0x14a   :  { %1117 = vmatpush.msra.mxu0 %v922_v25  ;;  %v1007_v62 = vsub.f32 %v1005_v32, %v1006_v24 }
 0x14b   :  { %1044 = vmatpush.msrb.mxu2 %v1977_v9  ;;  %1098 = vmatpush.msrb.mxu3 %v1997_v35 }
 0x14c   :  { %1121 = vmatpush.msra.mxu0 %v928_v29  ;;  %v1008_v16 = vand.u32 4294901760, %v1007_v62 }
 0x14d   :  { %1047 = vmatpush.msrb.mxu2 %v1991_v14  ;;  %1100 = vmatpush.msrb.mxu3 %v2007_v31 }
 0x14e   :  { %1125 = vmatpush.msra.mxu0 %v934_v36  ;;  %1009 = vmatpush.msrb.mxu1 %v1008_v16 }
 0x14f   :  { %1050 = vmatpush.msrb.mxu2 %v1995_v33  ;;  %1102 = vmatpush.msrb.mxu3 %v905_v26 }
 0x150   :  { %1129 = vmatpush.msra.mxu0 %v940_v50  ;;  %1015 = vmatpush.msrb.mxu1 %v1014_v7 }
 0x151   :  { %1053 = vmatpush.msrb.mxu2 %v2005_v1  ;;  %1104 = vmatpush.msrb.mxu3 %v907_v53 }
 0x152   :  { %1184 = vmatpush.msra.mxu1 %v1913_v2  ;;  %1133 = vmatpush.msra.mxu0 %v946_v51  ;;  %v1272_v2 = vld [vmem:[%s2121_s4] ss:$0 sm:$0xff] }
 0x153   :  { %1056 = vmatpush.msrb.mxu2 %v2015_v23  ;;  %1106 = vmatpush.msrb.mxu3 %v909_v39 }
 0x154   :  { %1186 = vmatpush.msra.mxu1 %v1915_v8  ;;  %1137 = vmatpush.msra.mxu0 %v952_v34 }
 0x155   :  { %1059 = vmatpush.msrb.mxu2 %v2024_v60 }
 0x156   :  { %1188 = vmatpush.msra.mxu1 %v1917_v10  ;;  %1141 = vmatpush.msra.mxu0 %v958_v28 }
 0x157   :  { %1062 = vmatpush.msrb.mxu2 %v999_v4 }
 0x158   :  { %1190 = vmatpush.msra.mxu1 %v1919_v41  ;;  %1145 = vmatpush.msra.mxu0 %v964_v0 }
 0x159   :  { %1065 = vmatpush.msrb.mxu2 %v1005_v32 }
 0x15a   :  { %1192 = vmatpush.msra.mxu1 %v1921_v3  ;;  %1149 = vmatpush.msra.mxu0 %v970_v63 }
 0x15b   :  { %1068 = vmatpush.msrb.mxu2 %v1011_v45 }
 0x15c   :  { %1194 = vmatpush.msra.mxu1 %v1923_v44  ;;  %1153 = vmatpush.msra.mxu0 %v976_v46 }
 0x15e   :  { %1196 = vmatpush.msra.mxu1 %v1935_v12  ;;  %1157 = vmatpush.msra.mxu0 %v982_v48 }
 0x160   :  { %1198 = vmatpush.msra.mxu1 %v1965_v5  ;;  %1161 = vmatpush.msra.mxu0 %v988_v37  ;;  %v1273_v5 = vld [vmem:[%s2123_s6] ss:$0 sm:$0xff] }
 0x162   :  { %1200 = vmatpush.msra.mxu1 %v1980_v42  ;;  %1165 = vmatpush.msra.mxu0 %v994_v17 }
 0x164   :  { %1202 = vmatpush.msra.mxu1 %v1982_v49  ;;  %1169 = vmatpush.msra.mxu0 %v1000_v57 }
 0x166   :  { %1204 = vmatpush.msra.mxu1 %v1987_v56  ;;  %1173 = vmatpush.msra.mxu0 %v1006_v24 }
 0x168   :  { %1206 = vmatpush.msra.mxu1 %v1997_v35  ;;  %1177 = vmatpush.msra.mxu0 %v1012_v15 }
 0x16a   :  { %1208 = vmatpush.msra.mxu1 %v2007_v31 }
 0x16c   :  { %1210 = vmatpush.msra.mxu1 %v905_v26 }
 0x16e   :  { %1212 = vmatpush.msra.mxu1 %v907_v53 }
 0x170   :  { %1214 = vmatpush.msra.mxu1 %v909_v39 }
 0x1b3   :  { %v710_v44 = vpop.f32.mrf.mxu0 }
 0x1b5   :  { %v749_v61 = vpop.f32.mrf.mxu1 }
 0x1b7   :  { %v656_v8 = vpop.f32.mrf.mxu3 }
 0x1bf   :  { %v555_v10 = vpop.f32.mrf.mxu2  ;;  %v855_v19 = vpop.f32.mrf.mxu3 }
 0x1c0   :  { %v556_v41 = vadd.f32 %v1272_v2, %v555_v10 }
 0x1c2   :  { %v657_v3 = vadd.f32 %v656_v8, %v556_v41 }
 0x1c4   :  { %v711_v47 = vadd.f32 %v710_v44, %v657_v3 }
 0x1c6   :  { %v750_v6 = vadd.f32 %v749_v61, %v711_v47 }
 0x1c7   :  { %v818_v12 = vpop.f32.mrf.mxu2 }
 0x1c8   :  { %v819_v13 = vadd.f32 %v818_v12, %v750_v6 }
 0x1ca   :  { %v856_v20 = vadd.f32 %v855_v19, %v819_v13 }
 0x1cc   :  { %v858_v25 = vmax.f32 %v856_v20, 0.0 }
 0x1ce   :  { %v911_v29 = vand.u32 4294901760, %v858_v25 }
 0x1d0   :  { %v912_v36 = vsub.f32 %v858_v25, %v911_v29  ;;  %1017 = vmatmul.f32.vlgmr.msrb.gmra.mxu1 %v911_v29 }
 0x1d2   :  { %1071 = vmatmul.f32.vlgmr.msrb.gmra.mxu2 %v912_v36  ;;  %v913_v50 = vand.u32 4294901760, %v912_v36 }
 0x1d4   :  { %1110 = vmatmul.f32.vlgmr.msrb.gmra.mxu3 %v913_v50  ;;  %v914_v51 = vsub.f32 %v912_v36, %v913_v50 }
 0x1d6   :  { %v915_v59 = vand.u32 4294901760, %v914_v51 }
 0x1d8   :  { %916 = vmatmul.f32.vlgmr.msrb.gmra.mxu0 %v915_v59  ;;  %1216 = vmatmul.f32.vlgmr.msra.gmra.mxu1 %v911_v29 }
 0x1e0   :  { %1179 = vmatmul.f32.vlgmr.msra.gmra.mxu0 %v911_v29 }
 0x24d   :  { %v1018_v34 = vpop.f32.mrf.mxu1 }
 0x255   :  { %v917_v28 = vpop.f32.mrf.mxu0  ;;  %v1072_v49 = vpop.f32.mrf.mxu2 }
 0x256   :  { %v918_v9 = vadd.f32 %v1273_v5, %v917_v28  ;;  %v1217_v63 = vpop.f32.mrf.mxu1 }
 0x257   :  { %v1111_v0 = vpop.f32.mrf.mxu3 }
 0x258   :  { %v1019_v42 = vadd.f32 %v1018_v34, %v918_v9 }
 0x25a   :  { %v1073_v56 = vadd.f32 %v1072_v49, %v1019_v42 }
 0x25c   :  { %v1112_v14 = vadd.f32 %v1111_v0, %v1073_v56 }
 0x25d   :  { %v1180_v33 = vpop.f32.mrf.mxu0 }
 0x25e   :  { %v1181_v35 = vadd.f32 %v1180_v33, %v1112_v14 }
 0x260   :  { %v1218_v1 = vadd.f32 %v1217_v63, %v1181_v35 }
 0x262   :  { %v1220_v31 = vmax.f32 %v1218_v1, 0.0 }
 0x264   :  { %1221 = vst [vmem:[#allocation8] sm:$0xff] %v1220_v31 }
 0x265   :  { %1232 = dma.vmem_to_hbm [thread:$0]  %s1228_s21, 128, %s1230_s24, [#allocation4]  }
 0x266   :  { %1374 = dma.done.wait [#allocation4], 128  }
 0x267   :  { %1375 = vsyncadd [#allocation4], 4294967168 }
 0x268   :  { %1237 = vsyncpa [#allocation3], 1 }
 0x269   :  { %1238 = vsyncpa [#allocation6], 1 }
 0x26a   :  { %1239 = vsyncpa [#allocation4], 1 }

</bundles_post_ra>
